<compile_context>
chip_gen: v7x
topology: tpu7x:2x2x1
jax: 0.10.0
libtpu: 0.0.40
codegen_flags: <defaults>
</compile_context>

<pallas_src>
import jax
import jax.numpy as jnp
import numpy as np
from jax.experimental import pallas as pl
from jax.experimental.pallas import tpu as pltpu

# Real (unpadded) layer widths from the PyTorch module.
FC1_S = 128
FC1_A = 32
FC2 = 200
FC3 = 128
FC4 = 64

# Lane-dense padded working widths used inside the kernel.
H = 128    # each layer-1 half (state: 128 real, action: 32 real -> padded 128)
D2 = 256   # layer-2 output (real 200)
D3 = 128   # layer-3 output (real 128)
D4 = 128   # layer-4 output (real 64)
DQ = 128   # q output (real action_size)

BN_EPS = 1e-5
LRELU_SLOPE = 0.01


def _bn_lrelu(z, gamma, beta, inv_b):
    """Training-mode BatchNorm1d (batch stats, biased var) + LeakyReLU,
    folded into a single FMA per element.  All math in f32."""
    s1 = jnp.sum(z, axis=0, keepdims=True)            # XLU reduce #1
    s2 = jnp.sum(z * z, axis=0, keepdims=True)        # XLU reduce #2 (independent)
    mean = s1 * inv_b
    var = jnp.maximum(s2 * inv_b - mean * mean, 0.0)  # biased variance
    scale = gamma * jax.lax.rsqrt(var + BN_EPS)       # EUP
    shift = beta - mean * scale
    y = z * scale + shift                             # one FMA per element
    return jnp.where(y > 0, y, LRELU_SLOPE * y)


def critic_kernel(s_ref, a_ref, w1s_ref, w1a_ref, w2_ref, w34q_ref, p_ref, q_ref):
    bf16 = jnp.bfloat16
    inv_b = 1.0 / s_ref.shape[0]

    # ---- Layer 1 (state / action paths).  Pre-BN biases are dropped: a
    # constant per-column bias in front of training-mode BN shifts the mean by
    # the same amount and leaves (z - mean) and var unchanged.
    zs = jnp.dot(s_ref[...], w1s_ref[...],
                 preferred_element_type=jnp.float32)              # (B, 128)
    za = jnp.dot(a_ref[...], w1a_ref[...],
                 preferred_element_type=jnp.float32)              # (B, 128), real 0:32
    xs = _bn_lrelu(zs, p_ref[0:1, 0:H], p_ref[1:2, 0:H], inv_b)
    xa = _bn_lrelu(za, p_ref[0:1, H:2 * H], p_ref[1:2, H:2 * H], inv_b)

    # ---- Layer 2: torch's concat([s, a]) @ W2 is computed as two bf16 dots
    # against the top / bottom halves of the packed (256, 256) W2 slab, so no
    # concat is materialised (in the kernel or the wrapper).
    z = (jnp.dot(xs.astype(bf16), w2_ref[0:H, :],
                 preferred_element_type=jnp.float32)
         + jnp.dot(xa.astype(bf16), w2_ref[H:2 * H, :],
                   preferred_element_type=jnp.float32))           # (B, 256), real 0:200
    x = _bn_lrelu(z, p_ref[2:3, :], p_ref[3:4, :], inv_b)

    # ---- Layer 3: 256 -> 128 (real 200 -> 128)
    z = jnp.dot(x.astype(bf16), w34q_ref[0:D2, :],
                preferred_element_type=jnp.float32)
    x = _bn_lrelu(z, p_ref[4:5, 0:D3], p_ref[5:6, 0:D3], inv_b)

    # ---- Layer 4: 128 -> 128 (real 128 -> 64)
    z = jnp.dot(x.astype(bf16), w34q_ref[D2:D2 + D3, :],
                preferred_element_type=jnp.float32)
    x = _bn_lrelu(z, p_ref[4:5, D3:D3 + D4], p_ref[5:6, D3:D3 + D4], inv_b)

    # ---- Q layer: the only bias that survives (not followed by BN).
    # Lane-dense (B, 128) store; the real action_size columns are sliced by
    # the caller.
    q_ref[...] = (jnp.dot(x.astype(bf16), w34q_ref[D2 + D3:D2 + D3 + D4, :],
                          preferred_element_type=jnp.float32)
                  + p_ref[6:7, 0:DQ])


def pack_params(params, state_size, action_size):
    """One-time layout conversion: pack the 22 PyTorch-shaped parameters into
    5 slabs (layer-1 weights f32, big weights bf16, gamma/beta/bias f32).
    Pre-BN biases are discarded here (exactly absorbed by training-mode BN)."""
    (w1s, b1s, g1s, be1s,
     w1a, b1a, g1a, be1a,
     w2, b2, g2, be2,
     w3, b3, g3, be3,
     w4, b4, g4, be4,
     wq, bq) = params
    del b1s, b1a, b2, b3, b4          # absorbed by the BatchNorm that follows
    f32, bf16 = jnp.float32, jnp.bfloat16

    # Layer-1 weights (tiny; kept f32). Action path padded to 128 output lanes.
    w1s_p = jnp.asarray(w1s, f32)                                       # (S, 128)
    w1a_p = jnp.zeros((action_size, H), f32).at[:, :FC1_A].set(
        jnp.asarray(w1a, f32))                                          # (A, 128)

    # Layer-2 weight slab (256, 256) bf16: rows 0:128 act on the state half,
    # rows 128:160 on the (padded) action half; real output columns 0:200.
    w2p = jnp.zeros((2 * H, D2), bf16)
    w2p = w2p.at[0:FC1_S, 0:FC2].set(w2[:FC1_S, :].astype(bf16))
    w2p = w2p.at[H:H + FC1_A, 0:FC2].set(w2[FC1_S:, :].astype(bf16))

    # W3 / W4 / Wq padded and stacked into one (512, 128) bf16 slab.
    w3p = jnp.zeros((D2, D3), bf16).at[:FC2, :].set(w3.astype(bf16))
    w4p = jnp.zeros((D3, D4), bf16).at[:, :FC4].set(w4.astype(bf16))
    wqp = jnp.zeros((D4, DQ), bf16).at[:FC4, :action_size].set(wq.astype(bf16))
    w34q = jnp.concatenate([w3p, w4p, wqp], axis=0)                     # (512, 128)

    # Gamma/beta + q-bias slab: tile-exact (8, 256) f32.  Padded gamma lanes
    # are 0, so scale=0 / shift=0 forces padded features to exactly 0 even if
    # padded weight columns were ever nonzero.
    def row(*pieces):
        out = jnp.zeros((2 * H,), f32)
        off = 0
        for v, width in pieces:
            v = jnp.asarray(v, f32).reshape(-1)
            out = out.at[off:off + v.shape[0]].set(v)
            off += width
        return out

    rows = [
        row((g1s, H), (g1a, H)),       # 0: gamma1  [state | action]
        row((be1s, H), (be1a, H)),     # 1: beta1   [state | action]
        row((g2, D2)),                 # 2: gamma2
        row((be2, D2)),                # 3: beta2
        row((g3, D3), (g4, D4)),       # 4: gamma3 | gamma4
        row((be3, D3), (be4, D4)),     # 5: beta3  | beta4
        row((bq, DQ)),                 # 6: q bias
        row(),                         # 7: pad to a full (8, 256) f32 tile
    ]
    pslab = jnp.stack(rows, axis=0)                                     # (8, 256)
    return w1s_p, w1a_p, w2p, w34q, pslab


def critic_forward(state, action, packed):
    """Single gridless pallas_call; state/action go in untouched (no concat).
    Batches that are a multiple of 8 keep every store unmasked; other batch
    sizes remain correct (masked stores, true-B statistics)."""
    w1s_p, w1a_p, w2p, w34q, pslab = packed
    B, S = state.shape
    A = action.shape[1]

    cost = pl.CostEstimate(
        flops=2 * B * (S * H + A * H + 2 * H * D2 + D2 * D3 + D3 * D4 + D4 * DQ),
        transcendentals=2 * H + D2 + D3 + D4,
        bytes_accessed=(4 * B * (S + A)                       # inputs (f32)
                        + 4 * (S * H + A * H)                 # layer-1 weights (f32)
                        + 2 * (2 * H * D2 + (D2 + D3 + D4) * D3)  # bf16 slabs
                        + 4 * 8 * 2 * H                       # gamma/beta slab
                        + 4 * B * DQ),                        # output
    )

    q_pad = pl.pallas_call(
        critic_kernel,
        out_shape=jax.ShapeDtypeStruct((B, DQ), jnp.float32),
        in_specs=[pl.BlockSpec(memory_space=pltpu.MemorySpace.VMEM)] * 7,
        out_specs=pl.BlockSpec(memory_space=pltpu.MemorySpace.VMEM),
        cost_estimate=cost,
    )(state.astype(jnp.float32), action.astype(jnp.float32),
      w1s_p, w1a_p, w2p, w34q, pslab)

    # Lane-dense store inside the kernel; slice the real action_size columns
    # here (callers that can consume the padded (B, 128) slab can skip this).
    return q_pad[:, :A]


def init_params(key, state_size, action_size):
    """Deterministic parameters mimicking the PyTorch init (kaiming weights,
    uniform biases, BN gamma=1 / beta=0).  Weights stored as (in, out)."""
    def layer(key, fan_in, fan_out):
        kw, kb = jax.random.split(key)
        std = np.sqrt(2.0 / fan_in)                       # kaiming_normal_, fan_in
        w = (std * jax.random.normal(kw, (fan_in, fan_out))).astype(jnp.float32)
        bound = 1.0 / np.sqrt(fan_in)
        b = jax.random.uniform(kb, (1, fan_out), minval=-bound,
                               maxval=bound).astype(jnp.float32)
        return w, b

    def bn(n):
        return jnp.ones((1, n), jnp.float32), jnp.zeros((1, n), jnp.float32)

    keys = jax.random.split(key, 6)
    w1s, b1s = layer(keys[0], state_size, FC1_S)
    g1s, be1s = bn(FC1_S)
    w1a, b1a = layer(keys[1], action_size, FC1_A)
    g1a, be1a = bn(FC1_A)
    w2, b2 = layer(keys[2], FC1_S + FC1_A, FC2)
    g2, be2 = bn(FC2)
    w3, b3 = layer(keys[3], FC2, FC3)
    g3, be3 = bn(FC3)
    w4, b4 = layer(keys[4], FC3, FC4)
    g4, be4 = bn(FC4)
    wq, bq = layer(keys[5], FC4, action_size)
    return (w1s, b1s, g1s, be1s,
            w1a, b1a, g1a, be1a,
            w2, b2, g2, be2,
            w3, b3, g3, be3,
            w4, b4, g4, be4,
            wq, bq)


def _ref_bn_lrelu(x, g, be):
    m = jnp.mean(x, axis=0, keepdims=True)
    v = jnp.mean((x - m) ** 2, axis=0, keepdims=True)
    y = (x - m) * jax.lax.rsqrt(v + BN_EPS) * g + be
    return jnp.where(y > 0, y, LRELU_SLOPE * y)


def reference_forward_f32(state, action, p):
    """Exact PyTorch-spec math in f32 (biases kept, centered-variance BN)."""
    (w1s, b1s, g1s, be1s, w1a, b1a, g1a, be1a,
     w2, b2, g2, be2, w3, b3, g3, be3, w4, b4, g4, be4, wq, bq) = p
    s = _ref_bn_lrelu(state @ w1s + b1s, g1s, be1s)
    a = _ref_bn_lrelu(action @ w1a + b1a, g1a, be1a)
    x = jnp.concatenate([s, a], axis=-1)
    x = _ref_bn_lrelu(x @ w2 + b2, g2, be2)
    x = _ref_bn_lrelu(x @ w3 + b3, g3, be3)
    x = _ref_bn_lrelu(x @ w4 + b4, g4, be4)
    return x @ wq + bq


def reference_forward_matched(state, action, p):
    """Spec math at the kernel's matmul precision: layer-1 dots in f32, the
    big dots with bf16 operands / f32 accumulation (biases kept — the kernel
    drops the BN-absorbed ones, which is exact up to f32 roundoff)."""
    (w1s, b1s, g1s, be1s, w1a, b1a, g1a, be1a,
     w2, b2, g2, be2, w3, b3, g3, be3, w4, b4, g4, be4, wq, bq) = p
    bf16 = jnp.bfloat16

    def mm16(x, w):
        return jnp.dot(x.astype(bf16), w.astype(bf16),
                       preferred_element_type=jnp.float32)

    s = _ref_bn_lrelu(state @ w1s + b1s, g1s, be1s)
    a = _ref_bn_lrelu(action @ w1a + b1a, g1a, be1a)
    x = jnp.concatenate([s, a], axis=-1)
    x = _ref_bn_lrelu(mm16(x, w2) + b2, g2, be2)
    x = _ref_bn_lrelu(mm16(x, w3) + b3, g3, be3)
    x = _ref_bn_lrelu(mm16(x, w4) + b4, g4, be4)
    return mm16(x, wq) + bq


if __name__ == "__main__":
    state_size, action_size, batch = 16, 4, 8
    key = jax.random.PRNGKey(0)
    k_state, k_action, k_params, k_big = jax.random.split(key, 4)

    state = jax.random.normal(k_state, (batch, state_size), dtype=jnp.float32)
    action = jax.random.normal(k_action, (batch, action_size), dtype=jnp.float32)
    params = init_params(k_params, state_size, action_size)
    packed = pack_params(params, state_size, action_size)

    q = critic_forward(state, action, packed)
    jax.block_until_ready(q)

    # 1) Mechanics check: kernel vs a pure-JAX reference at the *same* matmul
    #    precision.  Residual differences are only bias-absorption / variance-
    #    form f32 roundoff plus occasional bf16 rounding flips.
    q_matched = reference_forward_matched(state, action, params)
    np.testing.assert_allclose(np.asarray(q), np.asarray(q_matched),
                               rtol=1e-2, atol=1e-2)

    # 2) Spec check: kernel vs the exact f32 PyTorch-semantics reference.
    #    Tolerance is loose only because the kernel's big matmuls use bf16
    #    operands (f32 accumulation).
    q_f32 = reference_forward_f32(state, action, params)
    np.testing.assert_allclose(np.asarray(q), np.asarray(q_f32),
                               rtol=5e-2, atol=1e-1)

    # 3) Larger fused batch (amortises the fixed per-call latency; the
    #    recommended way to use this kernel in the DDPG training loop).
    big = 128
    state_b = jax.random.normal(jax.random.fold_in(k_big, 0),
                                (big, state_size), dtype=jnp.float32)
    action_b = jax.random.normal(jax.random.fold_in(k_big, 1),
                                 (big, action_size), dtype=jnp.float32)
    q_b = critic_forward(state_b, action_b, packed)
    jax.block_until_ready(q_b)
    q_b_ref = reference_forward_matched(state_b, action_b, params)
    np.testing.assert_allclose(np.asarray(q_b), np.asarray(q_b_ref),
                               rtol=1e-2, atol=1e-2)

    print("KERNEL_OK")
</pallas_src>

<mosaic_0001>
module attributes {stable_mosaic.version = 11 : i64} {
  func.func @critic_kernel(%arg0: memref<8x16xf32, #tpu.memory_space<vmem>>, %arg1: memref<8x4xf32, #tpu.memory_space<vmem>>, %arg2: memref<16x128xf32, #tpu.memory_space<vmem>>, %arg3: memref<4x128xf32, #tpu.memory_space<vmem>>, %arg4: memref<256x256xbf16, #tpu.memory_space<vmem>>, %arg5: memref<512x128xbf16, #tpu.memory_space<vmem>>, %arg6: memref<8x256xf32, #tpu.memory_space<vmem>>, %arg7: memref<8x128xf32, #tpu.memory_space<vmem>>) attributes {dimension_semantics = [], scalar_prefetch = 0 : i64, scratch_operands = 0 : i64, tpu.core_type = #tpu.core_type<tc>} {
    %c0 = arith.constant 0 : index
    %c0_0 = arith.constant 0 : index
    %0 = vector.load %arg0[%c0, %c0_0] : memref<8x16xf32, #tpu.memory_space<vmem>>, vector<8x16xf32>
    %c0_1 = arith.constant 0 : index
    %c0_2 = arith.constant 0 : index
    %1 = vector.load %arg2[%c0_1, %c0_2] : memref<16x128xf32, #tpu.memory_space<vmem>>, vector<16x128xf32>
    %cst = arith.constant dense<0.000000e+00> : vector<8x128xf32>
    %2 = tpu.matmul %0, %1, %cst {dimension_numbers = #tpu.dot_dimension_numbers<[1], [0], [0], [1], [0, 0, 1, 1], [], []>} : vector<8x16xf32>, vector<16x128xf32>, vector<8x128xf32> -> vector<8x128xf32>
    %c0_3 = arith.constant 0 : index
    %c0_4 = arith.constant 0 : index
    %3 = vector.load %arg1[%c0_3, %c0_4] : memref<8x4xf32, #tpu.memory_space<vmem>>, vector<8x4xf32>
    %c0_5 = arith.constant 0 : index
    %c0_6 = arith.constant 0 : index
    %4 = vector.load %arg3[%c0_5, %c0_6] : memref<4x128xf32, #tpu.memory_space<vmem>>, vector<4x128xf32>
    %cst_7 = arith.constant dense<0.000000e+00> : vector<8x128xf32>
    %5 = tpu.matmul %3, %4, %cst_7 {dimension_numbers = #tpu.dot_dimension_numbers<[1], [0], [0], [1], [0, 0, 1, 1], [], []>} : vector<8x4xf32>, vector<4x128xf32>, vector<8x128xf32> -> vector<8x128xf32>
    %c0_8 = arith.constant 0 : index
    %c0_9 = arith.constant 0 : index
    %6 = vector.load %arg6[%c0_8, %c0_9] : memref<8x256xf32, #tpu.memory_space<vmem>>, vector<1x128xf32>
    %c1 = arith.constant 1 : index
    %c0_10 = arith.constant 0 : index
    %7 = vector.load %arg6[%c1, %c0_10] : memref<8x256xf32, #tpu.memory_space<vmem>>, vector<1x128xf32>
    %cst_11 = arith.constant dense<0.000000e+00> : vector<128xf32>
    %8 = vector.multi_reduction <add>, %2, %cst_11 [0] : vector<8x128xf32> to vector<128xf32>
    %9 = vector.shape_cast %8 : vector<128xf32> to vector<1x128xf32>
    %10 = arith.mulf %2, %2 : vector<8x128xf32>
    %cst_12 = arith.constant dense<0.000000e+00> : vector<128xf32>
    %11 = vector.multi_reduction <add>, %10, %cst_12 [0] : vector<8x128xf32> to vector<128xf32>
    %12 = vector.shape_cast %11 : vector<128xf32> to vector<1x128xf32>
    %cst_13 = arith.constant 1.250000e-01 : f32
    %13 = vector.broadcast %cst_13 : f32 to vector<1x128xf32>
    %14 = arith.mulf %9, %13 : vector<1x128xf32>
    %cst_14 = arith.constant 1.250000e-01 : f32
    %15 = vector.broadcast %cst_14 : f32 to vector<1x128xf32>
    %16 = arith.mulf %12, %15 : vector<1x128xf32>
    %17 = arith.mulf %14, %14 : vector<1x128xf32>
    %18 = arith.subf %16, %17 : vector<1x128xf32>
    %cst_15 = arith.constant 0.000000e+00 : f32
    %19 = vector.broadcast %cst_15 : f32 to vector<1x128xf32>
    %20 = arith.maximumf %18, %19 : vector<1x128xf32>
    %cst_16 = arith.constant 9.99999974E-6 : f32
    %21 = vector.broadcast %cst_16 : f32 to vector<1x128xf32>
    %22 = arith.addf %20, %21 : vector<1x128xf32>
    %23 = math.rsqrt %22 : vector<1x128xf32>
    %24 = arith.mulf %6, %23 : vector<1x128xf32>
    %25 = arith.mulf %14, %24 : vector<1x128xf32>
    %26 = arith.subf %7, %25 : vector<1x128xf32>
    %27 = vector.broadcast %24 : vector<1x128xf32> to vector<8x128xf32>
    %28 = arith.mulf %2, %27 : vector<8x128xf32>
    %29 = vector.broadcast %26 : vector<1x128xf32> to vector<8x128xf32>
    %30 = arith.addf %28, %29 : vector<8x128xf32>
    %cst_17 = arith.constant 0.000000e+00 : f32
    %31 = vector.broadcast %cst_17 : f32 to vector<8x128xf32>
    %32 = arith.cmpf ogt, %30, %31 : vector<8x128xf32>
    %cst_18 = arith.constant 0.00999999977 : f32
    %33 = vector.broadcast %cst_18 : f32 to vector<8x128xf32>
    %34 = arith.mulf %33, %30 : vector<8x128xf32>
    %35 = arith.select %32, %30, %34 : vector<8x128xi1>, vector<8x128xf32>
    %c0_19 = arith.constant 0 : index
    %c128 = arith.constant 128 : index
    %36 = vector.load %arg6[%c0_19, %c128] : memref<8x256xf32, #tpu.memory_space<vmem>>, vector<1x128xf32>
    %c1_20 = arith.constant 1 : index
    %c128_21 = arith.constant 128 : index
    %37 = vector.load %arg6[%c1_20, %c128_21] : memref<8x256xf32, #tpu.memory_space<vmem>>, vector<1x128xf32>
    %cst_22 = arith.constant dense<0.000000e+00> : vector<128xf32>
    %38 = vector.multi_reduction <add>, %5, %cst_22 [0] : vector<8x128xf32> to vector<128xf32>
    %39 = vector.shape_cast %38 : vector<128xf32> to vector<1x128xf32>
    %40 = arith.mulf %5, %5 : vector<8x128xf32>
    %cst_23 = arith.constant dense<0.000000e+00> : vector<128xf32>
    %41 = vector.multi_reduction <add>, %40, %cst_23 [0] : vector<8x128xf32> to vector<128xf32>
    %42 = vector.shape_cast %41 : vector<128xf32> to vector<1x128xf32>
    %cst_24 = arith.constant 1.250000e-01 : f32
    %43 = vector.broadcast %cst_24 : f32 to vector<1x128xf32>
    %44 = arith.mulf %39, %43 : vector<1x128xf32>
    %cst_25 = arith.constant 1.250000e-01 : f32
    %45 = vector.broadcast %cst_25 : f32 to vector<1x128xf32>
    %46 = arith.mulf %42, %45 : vector<1x128xf32>
    %47 = arith.mulf %44, %44 : vector<1x128xf32>
    %48 = arith.subf %46, %47 : vector<1x128xf32>
    %cst_26 = arith.constant 0.000000e+00 : f32
    %49 = vector.broadcast %cst_26 : f32 to vector<1x128xf32>
    %50 = arith.maximumf %48, %49 : vector<1x128xf32>
    %cst_27 = arith.constant 9.99999974E-6 : f32
    %51 = vector.broadcast %cst_27 : f32 to vector<1x128xf32>
    %52 = arith.addf %50, %51 : vector<1x128xf32>
    %53 = math.rsqrt %52 : vector<1x128xf32>
    %54 = arith.mulf %36, %53 : vector<1x128xf32>
    %55 = arith.mulf %44, %54 : vector<1x128xf32>
    %56 = arith.subf %37, %55 : vector<1x128xf32>
    %57 = vector.broadcast %54 : vector<1x128xf32> to vector<8x128xf32>
    %58 = arith.mulf %5, %57 : vector<8x128xf32>
    %59 = vector.broadcast %56 : vector<1x128xf32> to vector<8x128xf32>
    %60 = arith.addf %58, %59 : vector<8x128xf32>
    %cst_28 = arith.constant 0.000000e+00 : f32
    %61 = vector.broadcast %cst_28 : f32 to vector<8x128xf32>
    %62 = arith.cmpf ogt, %60, %61 : vector<8x128xf32>
    %cst_29 = arith.constant 0.00999999977 : f32
    %63 = vector.broadcast %cst_29 : f32 to vector<8x128xf32>
    %64 = arith.mulf %63, %60 : vector<8x128xf32>
    %65 = arith.select %62, %60, %64 : vector<8x128xi1>, vector<8x128xf32>
    %66 = arith.truncf %35 : vector<8x128xf32> to vector<8x128xbf16>
    %c0_30 = arith.constant 0 : index
    %c0_31 = arith.constant 0 : index
    %67 = vector.load %arg4[%c0_30, %c0_31] : memref<256x256xbf16, #tpu.memory_space<vmem>>, vector<128x256xbf16>
    %cst_32 = arith.constant dense<0.000000e+00> : vector<8x256xf32>
    %68 = tpu.matmul %66, %67, %cst_32 {dimension_numbers = #tpu.dot_dimension_numbers<[1], [0], [0], [1], [0, 0, 1, 1], [], []>} : vector<8x128xbf16>, vector<128x256xbf16>, vector<8x256xf32> -> vector<8x256xf32>
    %69 = arith.truncf %65 : vector<8x128xf32> to vector<8x128xbf16>
    %c128_33 = arith.constant 128 : index
    %c0_34 = arith.constant 0 : index
    %70 = vector.load %arg4[%c128_33, %c0_34] : memref<256x256xbf16, #tpu.memory_space<vmem>>, vector<128x256xbf16>
    %cst_35 = arith.constant dense<0.000000e+00> : vector<8x256xf32>
    %71 = tpu.matmul %69, %70, %cst_35 {dimension_numbers = #tpu.dot_dimension_numbers<[1], [0], [0], [1], [0, 0, 1, 1], [], []>} : vector<8x128xbf16>, vector<128x256xbf16>, vector<8x256xf32> -> vector<8x256xf32>
    %72 = arith.addf %68, %71 : vector<8x256xf32>
    %c2 = arith.constant 2 : index
    %c0_36 = arith.constant 0 : index
    %73 = vector.load %arg6[%c2, %c0_36] : memref<8x256xf32, #tpu.memory_space<vmem>>, vector<1x256xf32>
    %c3 = arith.constant 3 : index
    %c0_37 = arith.constant 0 : index
    %74 = vector.load %arg6[%c3, %c0_37] : memref<8x256xf32, #tpu.memory_space<vmem>>, vector<1x256xf32>
    %cst_38 = arith.constant dense<0.000000e+00> : vector<256xf32>
    %75 = vector.multi_reduction <add>, %72, %cst_38 [0] : vector<8x256xf32> to vector<256xf32>
    %76 = vector.shape_cast %75 : vector<256xf32> to vector<1x256xf32>
    %77 = arith.mulf %72, %72 : vector<8x256xf32>
    %cst_39 = arith.constant dense<0.000000e+00> : vector<256xf32>
    %78 = vector.multi_reduction <add>, %77, %cst_39 [0] : vector<8x256xf32> to vector<256xf32>
    %79 = vector.shape_cast %78 : vector<256xf32> to vector<1x256xf32>
    %cst_40 = arith.constant 1.250000e-01 : f32
    %80 = vector.broadcast %cst_40 : f32 to vector<1x256xf32>
    %81 = arith.mulf %76, %80 : vector<1x256xf32>
    %cst_41 = arith.constant 1.250000e-01 : f32
    %82 = vector.broadcast %cst_41 : f32 to vector<1x256xf32>
    %83 = arith.mulf %79, %82 : vector<1x256xf32>
    %84 = arith.mulf %81, %81 : vector<1x256xf32>
    %85 = arith.subf %83, %84 : vector<1x256xf32>
    %cst_42 = arith.constant 0.000000e+00 : f32
    %86 = vector.broadcast %cst_42 : f32 to vector<1x256xf32>
    %87 = arith.maximumf %85, %86 : vector<1x256xf32>
    %cst_43 = arith.constant 9.99999974E-6 : f32
    %88 = vector.broadcast %cst_43 : f32 to vector<1x256xf32>
    %89 = arith.addf %87, %88 : vector<1x256xf32>
    %90 = math.rsqrt %89 : vector<1x256xf32>
    %91 = arith.mulf %73, %90 : vector<1x256xf32>
    %92 = arith.mulf %81, %91 : vector<1x256xf32>
    %93 = arith.subf %74, %92 : vector<1x256xf32>
    %94 = vector.broadcast %91 : vector<1x256xf32> to vector<8x256xf32>
    %95 = arith.mulf %72, %94 : vector<8x256xf32>
    %96 = vector.broadcast %93 : vector<1x256xf32> to vector<8x256xf32>
    %97 = arith.addf %95, %96 : vector<8x256xf32>
    %cst_44 = arith.constant 0.000000e+00 : f32
    %98 = vector.broadcast %cst_44 : f32 to vector<8x256xf32>
    %99 = arith.cmpf ogt, %97, %98 : vector<8x256xf32>
    %cst_45 = arith.constant 0.00999999977 : f32
    %100 = vector.broadcast %cst_45 : f32 to vector<8x256xf32>
    %101 = arith.mulf %100, %97 : vector<8x256xf32>
    %102 = arith.select %99, %97, %101 : vector<8x256xi1>, vector<8x256xf32>
    %103 = arith.truncf %102 : vector<8x256xf32> to vector<8x256xbf16>
    %c0_46 = arith.constant 0 : index
    %c0_47 = arith.constant 0 : index
    %104 = vector.load %arg5[%c0_46, %c0_47] : memref<512x128xbf16, #tpu.memory_space<vmem>>, vector<256x128xbf16>
    %cst_48 = arith.constant dense<0.000000e+00> : vector<8x128xf32>
    %105 = tpu.matmul %103, %104, %cst_48 {dimension_numbers = #tpu.dot_dimension_numbers<[1], [0], [0], [1], [0, 0, 1, 1], [], []>} : vector<8x256xbf16>, vector<256x128xbf16>, vector<8x128xf32> -> vector<8x128xf32>
    %c4 = arith.constant 4 : index
    %c0_49 = arith.constant 0 : index
    %106 = vector.load %arg6[%c4, %c0_49] : memref<8x256xf32, #tpu.memory_space<vmem>>, vector<1x128xf32>
    %c5 = arith.constant 5 : index
    %c0_50 = arith.constant 0 : index
    %107 = vector.load %arg6[%c5, %c0_50] : memref<8x256xf32, #tpu.memory_space<vmem>>, vector<1x128xf32>
    %cst_51 = arith.constant dense<0.000000e+00> : vector<128xf32>
    %108 = vector.multi_reduction <add>, %105, %cst_51 [0] : vector<8x128xf32> to vector<128xf32>
    %109 = vector.shape_cast %108 : vector<128xf32> to vector<1x128xf32>
    %110 = arith.mulf %105, %105 : vector<8x128xf32>
    %cst_52 = arith.constant dense<0.000000e+00> : vector<128xf32>
    %111 = vector.multi_reduction <add>, %110, %cst_52 [0] : vector<8x128xf32> to vector<128xf32>
    %112 = vector.shape_cast %111 : vector<128xf32> to vector<1x128xf32>
    %cst_53 = arith.constant 1.250000e-01 : f32
    %113 = vector.broadcast %cst_53 : f32 to vector<1x128xf32>
    %114 = arith.mulf %109, %113 : vector<1x128xf32>
    %cst_54 = arith.constant 1.250000e-01 : f32
    %115 = vector.broadcast %cst_54 : f32 to vector<1x128xf32>
    %116 = arith.mulf %112, %115 : vector<1x128xf32>
    %117 = arith.mulf %114, %114 : vector<1x128xf32>
    %118 = arith.subf %116, %117 : vector<1x128xf32>
    %cst_55 = arith.constant 0.000000e+00 : f32
    %119 = vector.broadcast %cst_55 : f32 to vector<1x128xf32>
    %120 = arith.maximumf %118, %119 : vector<1x128xf32>
    %cst_56 = arith.constant 9.99999974E-6 : f32
    %121 = vector.broadcast %cst_56 : f32 to vector<1x128xf32>
    %122 = arith.addf %120, %121 : vector<1x128xf32>
    %123 = math.rsqrt %122 : vector<1x128xf32>
    %124 = arith.mulf %106, %123 : vector<1x128xf32>
    %125 = arith.mulf %114, %124 : vector<1x128xf32>
    %126 = arith.subf %107, %125 : vector<1x128xf32>
    %127 = vector.broadcast %124 : vector<1x128xf32> to vector<8x128xf32>
    %128 = arith.mulf %105, %127 : vector<8x128xf32>
    %129 = vector.broadcast %126 : vector<1x128xf32> to vector<8x128xf32>
    %130 = arith.addf %128, %129 : vector<8x128xf32>
    %cst_57 = arith.constant 0.000000e+00 : f32
    %131 = vector.broadcast %cst_57 : f32 to vector<8x128xf32>
    %132 = arith.cmpf ogt, %130, %131 : vector<8x128xf32>
    %cst_58 = arith.constant 0.00999999977 : f32
    %133 = vector.broadcast %cst_58 : f32 to vector<8x128xf32>
    %134 = arith.mulf %133, %130 : vector<8x128xf32>
    %135 = arith.select %132, %130, %134 : vector<8x128xi1>, vector<8x128xf32>
    %136 = arith.truncf %135 : vector<8x128xf32> to vector<8x128xbf16>
    %c256 = arith.constant 256 : index
    %c0_59 = arith.constant 0 : index
    %137 = vector.load %arg5[%c256, %c0_59] : memref<512x128xbf16, #tpu.memory_space<vmem>>, vector<128x128xbf16>
    %cst_60 = arith.constant dense<0.000000e+00> : vector<8x128xf32>
    %138 = tpu.matmul %136, %137, %cst_60 {dimension_numbers = #tpu.dot_dimension_numbers<[1], [0], [0], [1], [0, 0, 1, 1], [], []>} : vector<8x128xbf16>, vector<128x128xbf16>, vector<8x128xf32> -> vector<8x128xf32>
    %c4_61 = arith.constant 4 : index
    %c128_62 = arith.constant 128 : index
    %139 = vector.load %arg6[%c4_61, %c128_62] : memref<8x256xf32, #tpu.memory_space<vmem>>, vector<1x128xf32>
    %c5_63 = arith.constant 5 : index
    %c128_64 = arith.constant 128 : index
    %140 = vector.load %arg6[%c5_63, %c128_64] : memref<8x256xf32, #tpu.memory_space<vmem>>, vector<1x128xf32>
    %cst_65 = arith.constant dense<0.000000e+00> : vector<128xf32>
    %141 = vector.multi_reduction <add>, %138, %cst_65 [0] : vector<8x128xf32> to vector<128xf32>
    %142 = vector.shape_cast %141 : vector<128xf32> to vector<1x128xf32>
    %143 = arith.mulf %138, %138 : vector<8x128xf32>
    %cst_66 = arith.constant dense<0.000000e+00> : vector<128xf32>
    %144 = vector.multi_reduction <add>, %143, %cst_66 [0] : vector<8x128xf32> to vector<128xf32>
    %145 = vector.shape_cast %144 : vector<128xf32> to vector<1x128xf32>
    %cst_67 = arith.constant 1.250000e-01 : f32
    %146 = vector.broadcast %cst_67 : f32 to vector<1x128xf32>
    %147 = arith.mulf %142, %146 : vector<1x128xf32>
    %cst_68 = arith.constant 1.250000e-01 : f32
    %148 = vector.broadcast %cst_68 : f32 to vector<1x128xf32>
    %149 = arith.mulf %145, %148 : vector<1x128xf32>
    %150 = arith.mulf %147, %147 : vector<1x128xf32>
    %151 = arith.subf %149, %150 : vector<1x128xf32>
    %cst_69 = arith.constant 0.000000e+00 : f32
    %152 = vector.broadcast %cst_69 : f32 to vector<1x128xf32>
    %153 = arith.maximumf %151, %152 : vector<1x128xf32>
    %cst_70 = arith.constant 9.99999974E-6 : f32
    %154 = vector.broadcast %cst_70 : f32 to vector<1x128xf32>
    %155 = arith.addf %153, %154 : vector<1x128xf32>
    %156 = math.rsqrt %155 : vector<1x128xf32>
    %157 = arith.mulf %139, %156 : vector<1x128xf32>
    %158 = arith.mulf %147, %157 : vector<1x128xf32>
    %159 = arith.subf %140, %158 : vector<1x128xf32>
    %160 = vector.broadcast %157 : vector<1x128xf32> to vector<8x128xf32>
    %161 = arith.mulf %138, %160 : vector<8x128xf32>
    %162 = vector.broadcast %159 : vector<1x128xf32> to vector<8x128xf32>
    %163 = arith.addf %161, %162 : vector<8x128xf32>
    %cst_71 = arith.constant 0.000000e+00 : f32
    %164 = vector.broadcast %cst_71 : f32 to vector<8x128xf32>
    %165 = arith.cmpf ogt, %163, %164 : vector<8x128xf32>
    %cst_72 = arith.constant 0.00999999977 : f32
    %166 = vector.broadcast %cst_72 : f32 to vector<8x128xf32>
    %167 = arith.mulf %166, %163 : vector<8x128xf32>
    %168 = arith.select %165, %163, %167 : vector<8x128xi1>, vector<8x128xf32>
    %169 = arith.truncf %168 : vector<8x128xf32> to vector<8x128xbf16>
    %c384 = arith.constant 384 : index
    %c0_73 = arith.constant 0 : index
    %170 = vector.load %arg5[%c384, %c0_73] : memref<512x128xbf16, #tpu.memory_space<vmem>>, vector<128x128xbf16>
    %cst_74 = arith.constant dense<0.000000e+00> : vector<8x128xf32>
    %171 = tpu.matmul %169, %170, %cst_74 {dimension_numbers = #tpu.dot_dimension_numbers<[1], [0], [0], [1], [0, 0, 1, 1], [], []>} : vector<8x128xbf16>, vector<128x128xbf16>, vector<8x128xf32> -> vector<8x128xf32>
    %c6 = arith.constant 6 : index
    %c0_75 = arith.constant 0 : index
    %172 = vector.load %arg6[%c6, %c0_75] : memref<8x256xf32, #tpu.memory_space<vmem>>, vector<1x128xf32>
    %173 = vector.broadcast %172 : vector<1x128xf32> to vector<8x128xf32>
    %174 = arith.addf %171, %173 : vector<8x128xf32>
    %c0_76 = arith.constant 0 : index
    %c0_77 = arith.constant 0 : index
    %175 = vector.load %arg7[%c0_76, %c0_77] : memref<8x128xf32, #tpu.memory_space<vmem>>, vector<8x128xf32>
    tpu.vector_store %arg7[%c0_76, %c0_77], %174 {strides = array<i32>} : memref<8x128xf32, #tpu.memory_space<vmem>>, vector<8x128xf32>,
    return
  }
}

</mosaic_0001>

<bundles_post_ra>
// kernel: tpu_custom_call.1
= control target key start
LH: loop header
LB: loop body
LE: loop exit
PB: predicated region body
PF: predicated region fallthrough
CT: control target
= control target key end

     0   :  { %12 = vsyncpa [#allocation3], 0  ;;  %s1741_s0 = inlined_call_operand.hbm [shape: f32[8,16], index: 0, kind: input, shape index: {}]   ;;  %s1742_s1 = inlined_call_operand.vmem [shape: f32[8,4], index: 1, kind: input, shape index: {}]   ;;  %s1743_s2 = inlined_call_operand.vmem [shape: f32[16,128], index: 2, kind: input, shape index: {}]   ;;  %s1744_s3 = inlined_call_operand.hbm [shape: f32[4,128], index: 3, kind: input, shape index: {}]   ;;  %s1745_s4 = inlined_call_operand.hbm [shape: bf16[256,256], index: 4, kind: input, shape index: {}]   ;;  %s1746_s5 = inlined_call_operand.hbm [shape: bf16[512,128], index: 5, kind: input, shape index: {}]   ;;  %s1747_s6 = inlined_call_operand.vmem [shape: f32[8,256], index: 6, kind: input, shape index: {}]   ;;  %s1748_s7 = inlined_call_operand.hbm [shape: f32[8,128], index: 7, kind: output, shape index: {}]  }
   0x1   :  { %13 = vsyncpa [#allocation6], 0 }
   0x2   :  { %14 = vsyncpa [#allocation9], 0 }
   0x3   :  { %15 = vsyncpa [#allocation4], 0  ;;  %s1544_s24 = smov [#allocation5]   ;;  %s1545_s26 = smov [#allocation2]  }
   0x4   :  { %s36_s25 = sshll.u32 %s1544_s24, 4  ;;  %s22_s27 = sshll.u32 %s1545_s26, 4  ;;  %s37_s25 = int_to_ptr.vmem [resolvable:$true] %s36_s25  ;;  %s23_s27 = int_to_ptr.vmem [resolvable:$true] %s22_s27 }
   0x5   :  { %s1426_s30 = scalar_lea.hbm %s1744_s3, 64 }
   0x6   :  { %p1427_p0 = scmp.ne.s32.totalorder %s1744_s3, %s1426_s30  ;;  %p1430_p1 = scmp.lt.u32.totalorder %s1426_s30, %s1744_s3 }
   0x8   :  { %p1432_p2 = pnand %p1430_p1, %p1427_p0 }
   0xa   :  { %1435 = shalt.err (!%p1432_p2)
}
   0xb   :  { %s1436_s12 = scalar_lea.vmem %s37_s25, 64  ;;  %p1441_p4 = scmp.lt.s32.totalorder %s37_s25, %s37_s25 }
   0xc   :  { %p1437_p3 = scmp.ne.s32.totalorder %s37_s25, %s1436_s12  ;;  %p1442_p5 = scmp.lt.s32.totalorder %s1436_s12, %s1436_s12 }
   0xe   :  { %p1443_p6 = por %p1442_p5, %p1441_p4 }
  0x10   :  { %p1444_p7 = pnand %p1443_p6, %p1437_p3 }
  0x12   :  { %1447 = shalt.err (!%p1444_p7)
}
  0x13   :  { %39 = dma.hbm_to_vmem [thread:$0]  %s1744_s3, 64, %s37_s25, [#allocation6]  }
  0x14   :  { %s1448_s17 = scalar_lea.hbm %s1741_s0, 128 }
  0x15   :  { %p1449_p8 = scmp.ne.s32.totalorder %s1741_s0, %s1448_s17  ;;  %p1452_p9 = scmp.lt.u32.totalorder %s1448_s17, %s1741_s0 }
  0x17   :  { %p1454_p10 = pnand %p1452_p9, %p1449_p8 }
  0x19   :  { %1457 = shalt.err (!%p1454_p10)
}
  0x1a   :  { %s1458_s22 = scalar_lea.vmem %s23_s27, 128  ;;  %p1463_p12 = scmp.lt.s32.totalorder %s23_s27, %s23_s27 }
  0x1b   :  { %p1459_p11 = scmp.ne.s32.totalorder %s23_s27, %s1458_s22  ;;  %p1464_p13 = scmp.lt.s32.totalorder %s1458_s22, %s1458_s22 }
  0x1d   :  { %p1465_p0 = por %p1464_p13, %p1463_p12 }
  0x1f   :  { %p1466_p1 = pnand %p1465_p0, %p1459_p11 }
  0x21   :  { %1469 = shalt.err (!%p1466_p1)
}
  0x22   :  { %25 = dma.hbm_to_vmem [thread:$0]  %s1741_s0, 128, %s23_s27, [#allocation3]  }
  0x23   :  { %s1546_s24 = smov [#allocation7]   ;;  %s1470_s29 = scalar_lea.hbm %s1745_s4, 4096 }
  0x24   :  { %s45_s25 = sshll.u32 %s1546_s24, 4  ;;  %p1471_p2 = scmp.ne.s32.totalorder %s1745_s4, %s1470_s29  ;;  %s46_s25 = int_to_ptr.vmem [resolvable:$true] %s45_s25 }
  0x25   :  { %p1474_p3 = scmp.lt.u32.totalorder %s1470_s29, %s1745_s4 }
  0x27   :  { %p1476_p4 = pnand %p1474_p3, %p1471_p2 }
  0x29   :  { %1479 = shalt.err (!%p1476_p4)
}
  0x2a   :  { %s1480_s11 = scalar_lea.vmem %s46_s25, 4096  ;;  %p1485_p6 = scmp.lt.s32.totalorder %s46_s25, %s46_s25 }
  0x2b   :  { %p1481_p5 = scmp.ne.s32.totalorder %s46_s25, %s1480_s11  ;;  %p1486_p7 = scmp.lt.s32.totalorder %s1480_s11, %s1480_s11 }
  0x2d   :  { %p1487_p8 = por %p1486_p7, %p1485_p6 }
  0x2f   :  { %p1488_p9 = pnand %p1487_p8, %p1481_p5 }
  0x31   :  { %1491 = shalt.err (!%p1488_p9)
}
  0x32   :  { %s1547_s0 = smov 128   ;;  %s1548_s27 = smov 8  }
  0x33   :  { %51 = dma.hbm_to_vmem [thread:$0]  %s1745_s4, 4096, %s46_s25, [#allocation6], %s1547_s0, %s1547_s0, %s1548_s27  }
  0x34   :  { %s1549_s14 = smov [#allocation8]   ;;  %s1492_s18 = scalar_lea.hbm %s1746_s5, 4096 }
  0x35   :  { %s57_s15 = sshll.u32 %s1549_s14, 4  ;;  %p1493_p10 = scmp.ne.s32.totalorder %s1746_s5, %s1492_s18  ;;  %s58_s15 = int_to_ptr.vmem [resolvable:$true] %s57_s15 }
  0x36   :  { %p1496_p11 = scmp.lt.u32.totalorder %s1492_s18, %s1746_s5 }
  0x38   :  { %p1498_p12 = pnand %p1496_p11, %p1493_p10 }
  0x3a   :  { %1501 = shalt.err (!%p1498_p12)
}
  0x3b   :  { %s1502_s3 = scalar_lea.vmem %s58_s15, 4096  ;;  %p1507_p0 = scmp.lt.s32.totalorder %s58_s15, %s58_s15 }
  0x3c   :  { %p1503_p13 = scmp.ne.s32.totalorder %s58_s15, %s1502_s3  ;;  %p1508_p1 = scmp.lt.s32.totalorder %s1502_s3, %s1502_s3 }
  0x3e   :  { %p1509_p2 = por %p1508_p1, %p1507_p0 }
  0x40   :  { %p1510_p3 = pnand %p1509_p2, %p1503_p13 }
  0x42   :  { %1513 = shalt.err (!%p1510_p3)
}
  0x43   :  { %s1550_s4 = smov 64   ;;  %s1551_s23 = smov 4  }
  0x44   :  { %63 = dma.hbm_to_vmem [thread:$0]  %s1746_s5, 4096, %s58_s15, [#allocation9], %s1550_s4, %s1550_s4, %s1551_s23  }
  0x45   :  { %1536 = dma.done.wait [#allocation3], 128  }
  0x46   :  { %1537 = vsyncadd [#allocation3], 4294967168 }
  0x47   :  { %1538 = dma.done.wait [#allocation6], 4160  }
  0x48   :  { %1539 = vsyncadd [#allocation6], 4294963136 }
  0x49   :  { %1540 = dma.done.wait [#allocation9], 4096  }
  0x4a   :  { %1541 = vsyncadd [#allocation9], 4294963200  ;;  %v1552_v0 = vmov 0.0|0.0   ;;  %vm1553_vm0 = vmmov 0   ;;  %v1554_v1 = vmov 0.0   ;;  %v80_v2 = vld [vmem:[%s1743_s2] sm:$0xff] }
  0x4b   :  { %1313 = vmatprep.subr.bf16.mxu0 %v1552_v0  ;;  %1265 = vmatprep.mubr.msk.f32.mxu0 %vm1553_vm0, %v1554_v1  ;;  %v81_v3 = vld [vmem:[%s1743_s2 + $0x8] sm:$0xff]  ;;  %v79_v5 = vld [vmem:[#allocation2] sm:$0xff]  ;;  %vm82_vm1 = vcmask 130048   ;;  %vm162_vm2 = vcmask 1043456   ;;  %vm158_vm3 = vcmask 31744   ;;  %v1555_v24 = vmov 0  }
  0x4c   :  { %v1314_v4 = vpack.c.bf16 %v81_v3, %v80_v2  ;;  %v157_v6 = vld [vmem:[#allocation5] sm:$0xf]  ;;  %v156_v7 = vld [vmem:[%s1742_s1] sm:$0xff]  ;;  %v1334_v8 = vld [vmem:[#allocation7 + $0x84] ss:$8 sps:$4 sm:$0xff]   ;;  %442 = vmatprep.mubr.bf16.mxu1 %v1555_v24  ;;  %s1557_s25 = smov [#allocation10]  }
  0x4d   :  { %v1336_v9 = vld [vmem:[#allocation7 + $0x80] ss:$8 sps:$4 sm:$0xff]   ;;  %410 = vmatprep.subr.bf16.mxu1 %v1334_v8  ;;  %v1337_v10 = vld [vmem:[#allocation7 + $0x94] ss:$8 sps:$4 sm:$0xff]   ;;  %v1339_v11 = vld [vmem:[#allocation7 + $0x90] ss:$8 sps:$4 sm:$0xff]  }
  0x4e   :  { %1315 = vmatpush3.bf16.msra.mxu0 %v1314_v4  ;;  %411 = vmatpush1.bf16.msra.mxu1 %v1336_v9  ;;  %v1340_v12 = vld [vmem:[#allocation7 + $0xa4] ss:$8 sps:$4 sm:$0xff]   ;;  %v1342_v13 = vld [vmem:[#allocation7 + $0xa0] ss:$8 sps:$4 sm:$0xff]   ;;  %v1343_v14 = vld [vmem:[#allocation7 + $0xb4] ss:$8 sps:$4 sm:$0xff]  }
  0x4f   :  { %1268 = vmatprep.subr.mxu0 %v1554_v1  ;;  %412 = vmatprep.subr.bf16.mxu1 %v1337_v10  ;;  %v1345_v15 = vld [vmem:[#allocation7 + $0xb0] ss:$8 sps:$4 sm:$0xff]   ;;  %v1346_v16 = vld [vmem:[#allocation7 + $0xc4] ss:$8 sps:$4 sm:$0xff]   ;;  %v1348_v17 = vld [vmem:[#allocation7 + $0xc0] ss:$8 sps:$4 sm:$0xff]  }
  0x50   :  { %v1349_v18 = vld [vmem:[#allocation7 + $0xd4] ss:$8 sps:$4 sm:$0xff]   ;;  %v1351_v19 = vld [vmem:[#allocation7 + $0xd0] ss:$8 sps:$4 sm:$0xff]   ;;  %v1352_v20 = vld [vmem:[#allocation7 + $0xe4] ss:$8 sps:$4 sm:$0xff]  }
  0x51   :  { %1266 = vmatmul.mubr.msk.f32.vlgmr.msra.gmra.mrb[0].mxu0 %vm82_vm1, %v79_v5  ;;  %v1354_v21 = vld [vmem:[#allocation7 + $0xe0] ss:$8 sps:$4 sm:$0xff]   ;;  %v1355_v22 = vld [vmem:[#allocation7 + $0xf4] ss:$8 sps:$4 sm:$0xff]   ;;  %v1357_v23 = vld [vmem:[#allocation7 + $0xf0] ss:$8 sps:$4 sm:$0xff]  }
  0x52   :  { %1269 = vmatpush3.msk.msra.mxu0 %vm162_vm2, %v157_v6  ;;  %1270 = vmatprep.mubr.msk.f32.mxu0 %vm1553_vm0, %v1554_v1  ;;  %v1360_v25 = vld [vmem:[#allocation7 + $0x4] ss:$8 sps:$4 sm:$0xff]   ;;  %v266_v3 = vld [vmem:[%s1747_s6 + $0x8] ss:$0 sm:$0xff]  ;;  %s1136_s26 = sshll.u32 %s1557_s25, 4  ;;  %s1137_s26 = int_to_ptr.vmem [resolvable:$true] %s1136_s26 }
  0x53   :  { %413 = vmatpush1.bf16.msra.mxu1 %v1339_v11  ;;  %s1514_s28 = scalar_lea.vmem %s1137_s26, 128  ;;  %p1519_p5 = scmp.lt.s32.totalorder %s1137_s26, %s1137_s26 }
  0x54   :  { %414 = vmatprep.subr.bf16.mxu1 %v1340_v12  ;;  %p1515_p4 = scmp.ne.s32.totalorder %s1137_s26, %s1514_s28  ;;  %p1520_p6 = scmp.lt.s32.totalorder %s1514_s28, %s1514_s28 }
  0x55   :  { %1271 = vmatmul.mubr.msk.f32.vlgmr.msra.gmra.mrb[2].mxu0 %vm158_vm3, %v156_v7  ;;  %v267_v7 = vld [vmem:[%s1747_s6 + $0x9] ss:$0 sm:$0xff] }
  0x56   :  { %p1521_p7 = por %p1520_p6, %p1519_p5 }
  0x57   :  { %415 = vmatpush1.bf16.msra.mxu1 %v1342_v13 }
  0x58   :  { %416 = vmatprep.subr.bf16.mxu1 %v1343_v14  ;;  %v1358_v14 = vld [vmem:[#allocation7] ss:$8 sps:$4 sm:$0xff]   ;;  %p1522_p8 = pnand %p1521_p7, %p1515_p4 }
  0x5b   :  { %417 = vmatpush1.bf16.msra.mxu1 %v1345_v15 }
  0x5c   :  { %418 = vmatprep.subr.bf16.mxu1 %v1346_v16 }
  0x5f   :  { %419 = vmatpush1.bf16.msra.mxu1 %v1348_v17  ;;  %v1363_v17 = vld [vmem:[#allocation7 + $0x14] ss:$8 sps:$4 sm:$0xff]  }
  0x60   :  { %420 = vmatprep.subr.bf16.mxu1 %v1349_v18  ;;  %v1361_v18 = vld [vmem:[#allocation7 + $0x10] ss:$8 sps:$4 sm:$0xff]  }
  0x63   :  { %421 = vmatpush1.bf16.msra.mxu1 %v1351_v19  ;;  %v1366_v19 = vld [vmem:[#allocation7 + $0x24] ss:$8 sps:$4 sm:$0xff]  }
  0x64   :  { %422 = vmatprep.subr.bf16.mxu1 %v1352_v20 }
  0x67   :  { %423 = vmatpush1.bf16.msra.mxu1 %v1354_v21  ;;  %v236_v21 = vld [vmem:[%s1747_s6] ss:$0 sm:$0xff] }
  0x68   :  { %424 = vmatprep.subr.bf16.mxu1 %v1355_v22  ;;  %v1364_v22 = vld [vmem:[#allocation7 + $0x20] ss:$8 sps:$4 sm:$0xff]  }
  0x6b   :  { %425 = vmatpush1.bf16.msra.mxu1 %v1357_v23  ;;  %v1369_v23 = vld [vmem:[#allocation7 + $0x34] ss:$8 sps:$4 sm:$0xff]  }
  0x6c   :  { %531 = vmatprep.subr.bf16.mxu1 %v1360_v25 }
 0x124   :  { %v1661_v26 = vpop.f32.mrb[0].mxu0 }
 0x125   :  { %v238_v27 = vrot.slane %v1661_v26, 4  ;;  %v244_v28 = vmul.f32 %v1661_v26, %v1661_v26  ;;  %v1267_v29 = vpop.f32.mrb[1].mxu0 }
 0x127   :  { %v239_v31 = vadd.f32 %v238_v27, %v1661_v26  ;;  %v245_v32 = vrot.slane %v244_v28, 4  ;;  %v1367_v27 = vld [vmem:[#allocation7 + $0x30] ss:$8 sps:$4 sm:$0xff]  }
 0x128   :  { %v232_v30 = vpop.f32.mrb[2].mxu0 }
 0x129   :  { %v268_v33 = vrot.slane %v232_v30, 4  ;;  %v274_v34 = vmul.f32 %v232_v30, %v232_v30  ;;  %v1272_v35 = vpop.f32.mrb[3].mxu0  ;;  %v240_v38 = vrot.slane %v239_v31, 2  ;;  %v246_v39 = vadd.f32 %v245_v32, %v244_v28  ;;  %v1372_v28 = vld [vmem:[#allocation7 + $0x44] ss:$8 sps:$4 sm:$0xff]  }
 0x12a   :  { %v1378_v35 = vld [vmem:[#allocation7 + $0x64] ss:$8 sps:$4 sm:$0xff]  }
 0x12b   :  { %v269_v36 = vadd.f32 %v268_v33, %v232_v30  ;;  %v275_v37 = vrot.slane %v274_v34, 4  ;;  %v241_v44 = vadd.f32 %v240_v38, %v239_v31  ;;  %v247_v45 = vrot.slane %v246_v39, 2  ;;  %v1375_v31 = vld [vmem:[#allocation7 + $0x54] ss:$8 sps:$4 sm:$0xff]  }
 0x12c   :  { %v1381_v38 = vld [vmem:[#allocation7 + $0x74] ss:$8 sps:$4 sm:$0xff]  }
 0x12d   :  { %v270_v40 = vrot.slane %v269_v36, 2  ;;  %v276_v41 = vadd.f32 %v275_v37, %v274_v34  ;;  %v242_v50 = vrot.slane %v241_v44, 1  ;;  %v248_v51 = vadd.f32 %v247_v45, %v246_v39  ;;  %v1373_v34 = vld [vmem:[#allocation7 + $0x50] ss:$8 sps:$4 sm:$0xff]   ;;  %v1376_v37 = vld [vmem:[#allocation7 + $0x60] ss:$8 sps:$4 sm:$0xff]  }
 0x12e   :  { %v1385_v45 = vld [vmem:[#allocation8 + $0x8] sm:$0xff]  }
 0x12f   :  { %v271_v42 = vadd.f32 %v270_v40, %v269_v36  ;;  %v277_v43 = vrot.slane %v276_v41, 2  ;;  %v243_v56 = vadd.f32 %v242_v50, %v241_v44  ;;  %v249_v57 = vrot.slane %v248_v51, 1  ;;  %v1379_v40 = vld [vmem:[#allocation7 + $0x70] ss:$8 sps:$4 sm:$0xff]   ;;  %v1384_v44 = vld [vmem:[#allocation8 + $0x48] sm:$0xff]   ;;  %v1390_v50 = vld [vmem:[#allocation8 + $0x60] sm:$0xff]  }
 0x131   :  { %v272_v46 = vrot.slane %v271_v42, 1  ;;  %v278_v47 = vadd.f32 %v277_v43, %v276_v41  ;;  %v250_v60 = vadd.f32 %v249_v57, %v248_v51  ;;  %v251_v61 = vmul.f32 0.125, %v243_v56  ;;  %v1383_v43 = vld [vmem:[#allocation8] sm:$0xff]   ;;  %v1396_v56 = vld [vmem:[#allocation8 + $0x78] sm:$0xff]  }
 0x132   :  { %v1391_v51 = vld [vmem:[#allocation8 + $0x20] sm:$0xff]   ;;  %v1397_v57 = vld [vmem:[#allocation8 + $0x38] sm:$0xff]  }
 0x133   :  { %v273_v48 = vadd.f32 %v272_v46, %v271_v42  ;;  %v279_v49 = vrot.slane %v278_v47, 1  ;;  %v252_v63 = vmul.f32 0.125, %v250_v60  ;;  %v253_v0 = vmul.f32 %v251_v61, %v251_v61  ;;  %v1386_v46 = vld [vmem:[#allocation8 + $0x50] sm:$0xff]  }
 0x135   :  { %v280_v52 = vadd.f32 %v279_v49, %v278_v47  ;;  %v281_v53 = vmul.f32 0.125, %v273_v48  ;;  %v254_v2 = vsub.f32 %v252_v63, %v253_v0  ;;  %v1387_v47 = vld [vmem:[#allocation8 + $0x10] sm:$0xff]   ;;  %v1388_v48 = vld [vmem:[#allocation8 + $0x58] sm:$0xff]  }
 0x136   :  { %v1389_v49 = vld [vmem:[#allocation8 + $0x18] sm:$0xff]  }
 0x137   :  { %v282_v54 = vmul.f32 0.125, %v280_v52  ;;  %v283_v55 = vmul.f32 %v281_v53, %v281_v53  ;;  %v255_v5 = vmax.f32 %v254_v2, 0.0  ;;  %v1392_v52 = vld [vmem:[#allocation8 + $0x68] sm:$0xff]  }
 0x139   :  { %v284_v58 = vsub.f32 %v282_v54, %v283_v55  ;;  %v256_v9 = vadd.f32 1e-05, %v255_v5  ;;  %v1394_v54 = vld [vmem:[#allocation8 + $0x70] sm:$0xff]  }
 0x13a   :  { %v1395_v55 = vld [vmem:[#allocation8 + $0x30] sm:$0xff]  }
 0x13b   :  { %v285_v59 = vmax.f32 %v284_v58, 0.0 }
 0x13d   :  { %v286_v62 = vadd.f32 1e-05, %v285_v59 }
 0x13f   :  { %1414 = vrsqrt.f32 %v286_v62 }
 0x140   :  { %1416 = vrsqrt.f32 %v256_v9 }
 0x149   :  { %v1415_v4 = vpop.eup %1414 }
 0x14a   :  { %v288_v6 = vmul.f32 %v1415_v4, %v266_v3  ;;  %v1417_v20 = vpop.eup %1416 }
 0x14b   :  { %v258_v25 = vmul.f32 %v1417_v20, %v236_v21 }
 0x14c   :  { %v289_v8 = vmul.f32 %v288_v6, %v281_v53  ;;  %v291_v11 = vmul.f32 %v288_v6, %v232_v30  ;;  %v1370_v30 = vld [vmem:[#allocation7 + $0x40] ss:$8 sps:$4 sm:$0xff]  }
 0x14d   :  { %v259_v29 = vmul.f32 %v258_v25, %v251_v61  ;;  %v261_v33 = vmul.f32 %v258_v25, %v1661_v26  ;;  %v1382_v26 = vld [vmem:[#allocation8 + $0x40] sm:$0xff]   ;;  %v1393_v53 = vld [vmem:[#allocation8 + $0x28] sm:$0xff]  }
 0x14e   :  { %v290_v10 = vsub.f32 %v267_v7, %v289_v8  ;;  %1221 = vmatprep.subr.bf16.mxu0 %v1382_v26 }
 0x14f   :  { %1222 = vmatpush3.bf16.msra.mxu0 %v1383_v43 }
 0x150   :  { %v292_v12 = vadd.f32 %v291_v11, %v290_v10  ;;  %1223 = vmatprep.subr.bf16.mxu0 %v1384_v44 }
 0x152   :  { %vm293_vm4 = vcmp.gt.f32.partialorder %v292_v12, 0.0  ;;  %v294_v13 = vmul.f32 0.01, %v292_v12 }
 0x153   :  { %1224 = vmatpush3.bf16.msra.mxu0 %v1385_v45 }
 0x154   :  { %v295_v15 = vsel %vm293_vm4, %v292_v12, %v294_v13  ;;  %1225 = vmatprep.subr.bf16.mxu0 %v1386_v46 }
 0x155   :  { %v313_v16 = vpack.c.bf16 %v295_v15, %v295_v15 }
 0x157   :  { %443 = vmatmul.mubr.bf16.vlgmr.msra.gmra.mrb[0].mxu1 %v313_v16  ;;  %1226 = vmatpush3.bf16.msra.mxu0 %v1387_v47  ;;  %v1182_v47 = vld [vmem:[%s1747_s6 + $0x2] ss:$8 sm:$0x3] }
 0x158   :  { %532 = vmatpush1.bf16.msra.mxu1 %v1358_v14  ;;  %563 = vmatprep.mubr.bf16.mxu1 %v1555_v24  ;;  %v237_v24 = vld [vmem:[%s1747_s6 + $0x1] ss:$0 sm:$0xff] }
 0x159   :  { %533 = vmatprep.subr.bf16.mxu1 %v1363_v17  ;;  %v260_v32 = vsub.f32 %v237_v24, %v259_v29  ;;  %1227 = vmatprep.subr.bf16.mxu0 %v1388_v48 }
 0x15b   :  { %v262_v36 = vadd.f32 %v261_v33, %v260_v32  ;;  %1228 = vmatpush3.bf16.msra.mxu0 %v1389_v49 }
 0x15c   :  { %534 = vmatpush1.bf16.msra.mxu1 %v1361_v18  ;;  %1229 = vmatprep.subr.bf16.mxu0 %v1390_v50 }
 0x15d   :  { %535 = vmatprep.subr.bf16.mxu1 %v1366_v19  ;;  %v264_v39 = vmul.f32 0.01, %v262_v36  ;;  %vm263_vm5 = vcmp.gt.f32.partialorder %v262_v36, 0.0 }
 0x15f   :  { %v265_v41 = vsel %vm263_vm5, %v262_v36, %v264_v39  ;;  %1230 = vmatpush3.bf16.msra.mxu0 %v1391_v51 }
 0x160   :  { %536 = vmatpush1.bf16.msra.mxu1 %v1364_v22  ;;  %v296_v42 = vpack.c.bf16 %v265_v41, %v265_v41  ;;  %1231 = vmatprep.subr.bf16.mxu0 %v1392_v52 }
 0x161   :  { %537 = vmatprep.subr.bf16.mxu1 %v1369_v23 }
 0x163   :  { %1232 = vmatpush3.bf16.msra.mxu0 %v1393_v53 }
 0x164   :  { %538 = vmatpush1.bf16.msra.mxu1 %v1367_v27  ;;  %1233 = vmatprep.subr.bf16.mxu0 %v1394_v54 }
 0x165   :  { %539 = vmatprep.subr.bf16.mxu1 %v1372_v28 }
 0x167   :  { %1234 = vmatpush3.bf16.msra.mxu0 %v1395_v55 }
 0x168   :  { %540 = vmatpush1.bf16.msra.mxu1 %v1370_v30  ;;  %1235 = vmatprep.subr.bf16.mxu0 %v1396_v56 }
 0x169   :  { %541 = vmatprep.subr.bf16.mxu1 %v1375_v31 }
 0x16b   :  { %1236 = vmatpush3.bf16.msra.mxu0 %v1397_v57 }
 0x16c   :  { %542 = vmatpush1.bf16.msra.mxu1 %v1373_v34  ;;  %1273 = vmatprep.subr.bf16.mxu0 %v1554_v1 }
 0x16d   :  { %543 = vmatprep.subr.bf16.mxu1 %v1378_v35 }
 0x170   :  { %544 = vmatpush1.bf16.msra.mxu1 %v1376_v37 }
 0x171   :  { %545 = vmatprep.subr.bf16.mxu1 %v1381_v38  ;;  %v1556_v38 = vmov 1966171168  }
 0x172   :  { %v620_v39 = vunpack.c.l.s4 %v1556_v38 }
 0x174   :  { %546 = vmatpush1.bf16.msra.mxu1 %v1379_v40  ;;  %v622_v40 = vlaneseq  ;;  %v621_v41 = vunpack.c.0.s8 %v620_v39 }
 0x175   :  { %1293 = vmatprep.subr.bf16.mxu1 %v1554_v1 }
 0x177   :  { %564 = vmatmul.mubr.bf16.vlgmr.msra.gmra.mrb[0].mxu1 %v296_v42  ;;  %v623_v42 = vshrl.u32 %v622_v40, 7 }
 0x178   :  { %1309 = vmatprep.mubr.msk.bf16.mxu1 %vm1553_vm0, %v1554_v1 }
 0x179   :  { %v624_v43 = vsub.s32 %v621_v41, %v623_v42  ;;  %v638_v49 = vsub.s32 0, %v623_v42  ;;  %v642_v50 = vsub.s32 1, %v623_v42 }
 0x24a   :  { %v1685_v58 = vpop.f32.mrb[0].mxu1 }
 0x24b   :  { %v576_v59 = vrot.slane %v1685_v58, 4  ;;  %v588_v60 = vmul.f32 %v1685_v58, %v1685_v58  ;;  %v567_v61 = vpop.f32.mrb[1].mxu1 }
 0x24c   :  { %v582_v62 = vrot.slane %v567_v61, 4  ;;  %v589_v63 = vmul.f32 %v567_v61, %v567_v61  ;;  %v569_v0 = vpop.f32.mrb[2].mxu1 }
 0x24d   :  { %v577_v2 = vadd.f32 %v576_v59, %v1685_v58  ;;  %v590_v3 = vrot.slane %v588_v60, 4  ;;  %v570_v4 = vpop.f32.mrb[3].mxu1 }
 0x24e   :  { %v583_v5 = vadd.f32 %v582_v62, %v567_v61  ;;  %v596_v6 = vrot.slane %v589_v63, 4  ;;  %v1183_v62 = vld [vmem:[%s1747_s6 + $0x3] ss:$8 sm:$0x3] }
 0x24f   :  { %v578_v7 = vrot.slane %v577_v2, 2  ;;  %v591_v8 = vadd.f32 %v590_v3, %v588_v60 }
 0x250   :  { %v584_v9 = vrot.slane %v583_v5, 2  ;;  %v597_v10 = vadd.f32 %v596_v6, %v589_v63 }
 0x251   :  { %v579_v11 = vadd.f32 %v578_v7, %v577_v2  ;;  %v592_v12 = vrot.slane %v591_v8, 2 }
 0x252   :  { %v585_v13 = vadd.f32 %v584_v9, %v583_v5  ;;  %v598_v14 = vrot.slane %v597_v10, 2 }
 0x253   :  { %v580_v15 = vrot.slane %v579_v11, 1  ;;  %v593_v16 = vadd.f32 %v592_v12, %v591_v8  ;;  %v1400_v12 = vld [vmem:[#allocation8 + $0x90] sm:$0xff]  }
 0x254   :  { %v586_v17 = vrot.slane %v585_v13, 1  ;;  %v599_v18 = vadd.f32 %v598_v14, %v597_v10  ;;  %v1398_v10 = vld [vmem:[#allocation8 + $0x80] sm:$0xff]  }
 0x255   :  { %v581_v19 = vadd.f32 %v580_v15, %v579_v11  ;;  %v594_v20 = vrot.slane %v593_v16, 1  ;;  %v1399_v11 = vld [vmem:[#allocation8 + $0x88] sm:$0xff]   ;;  %v1402_v14 = vld [vmem:[#allocation8 + $0xa0] sm:$0xff]  }
 0x256   :  { %v587_v21 = vadd.f32 %v586_v17, %v585_v13  ;;  %v600_v22 = vrot.slane %v599_v18, 1  ;;  %v1401_v13 = vld [vmem:[#allocation8 + $0x98] sm:$0xff]   ;;  %v1403_v15 = vld [vmem:[#allocation8 + $0xa8] sm:$0xff]  }
 0x257   :  { %v595_v23 = vadd.f32 %v594_v20, %v593_v16  ;;  %v602_v25 = vmul.f32 0.125, %v581_v19  ;;  %v1404_v16 = vld [vmem:[#allocation8 + $0xb0] sm:$0xff]   ;;  %v1405_v17 = vld [vmem:[#allocation8 + $0xb8] sm:$0xff]  }
 0x258   :  { %v601_v27 = vadd.f32 %v600_v22, %v599_v18  ;;  %v603_v28 = vmul.f32 0.125, %v587_v21 }
 0x259   :  { %v604_v29 = vmul.f32 0.125, %v595_v23  ;;  %v606_v24 = vmul.f32 %v602_v25, %v602_v25 }
 0x25a   :  { %v605_v30 = vmul.f32 0.125, %v601_v27  ;;  %v607_v31 = vmul.f32 %v603_v28, %v603_v28 }
 0x25b   :  { %v608_v32 = vsub.f32 %v604_v29, %v606_v24 }
 0x25c   :  { %v609_v33 = vsub.f32 %v605_v30, %v607_v31 }
 0x25d   :  { %v610_v34 = vmax.f32 %v608_v32, 0.0 }
 0x25e   :  { %v611_v35 = vmax.f32 %v609_v33, 0.0 }
 0x25f   :  { %v612_v36 = vadd.f32 1e-05, %v610_v34 }
 0x260   :  { %v613_v37 = vadd.f32 1e-05, %v611_v35 }
 0x261   :  { %1418 = vrsqrt.f32 %v612_v36 }
 0x262   :  { %1420 = vrsqrt.f32 %v613_v37 }
 0x26b   :  { %v1419_v26 = vpop.eup %1418 }
 0x26c   :  { %v1421_v44 = vpop.eup %1420 }
 0x26d   :  { %v618_v45 = vcombine.low %v1419_v26, %v1421_v44  ;;  %v858_v26 = vld [vmem:[%s1747_s6 + $0x4] ss:$0 sm:$0xff] }
 0x26f   :  { %v625_v46 = vrot.slane %v618_v45, %v624_v43  ;;  %v859_v45 = vld [vmem:[%s1747_s6 + $0x5] ss:$0 sm:$0xff] }
 0x271   :  { %v632_v48 = vrot.slane %v625_v46, %v624_v43 }
 0x273   :  { %v634_v51 = vmul.f32 %v1182_v47, %v632_v48 }
 0x275   :  { %v639_v52 = vrot.slane %v634_v51, %v638_v49  ;;  %v643_v53 = vrot.slane %v634_v51, %v642_v50 }
 0x277   :  { %v646_v54 = vmul.f32 %v639_v52, %v602_v25  ;;  %v647_v55 = vmul.f32 %v643_v53, %v603_v28  ;;  %v667_v56 = vmul.f32 %v639_v52, %v1685_v58  ;;  %v668_v57 = vmul.f32 %v643_v53, %v567_v61  ;;  %v1406_v53 = vld [vmem:[#allocation8 + $0xc0] sm:$0xff]  }
 0x278   :  { %1294 = vmatpush3.bf16.msra.mxu1 %v1406_v53 }
 0x279   :  { %v650_v59 = vcombine.low %v646_v54, %v647_v55  ;;  %1295 = vmatprep.subr.bf16.mxu1 %v1554_v1  ;;  %v1407_v54 = vld [vmem:[#allocation8 + $0xc8] sm:$0xff]   ;;  %v1408_v55 = vld [vmem:[#allocation8 + $0xd0] sm:$0xff]  }
 0x27b   :  { %v657_v60 = vrot.slane %v650_v59, %v624_v43  ;;  %v1411_v59 = vld [vmem:[#allocation8 + $0xe8] sm:$0xff]  }
 0x27c   :  { %1296 = vmatpush3.bf16.msra.mxu1 %v1407_v54 }
 0x27d   :  { %v664_v63 = vrot.slane %v657_v60, %v624_v43  ;;  %1297 = vmatprep.subr.bf16.mxu1 %v1554_v1  ;;  %v1412_v60 = vld [vmem:[#allocation8 + $0xf0] sm:$0xff]  }
 0x27f   :  { %v666_v0 = vsub.f32 %v1183_v62, %v664_v63  ;;  %v1413_v62 = vld [vmem:[#allocation8 + $0xf8] sm:$0xff]  }
 0x280   :  { %1298 = vmatpush3.bf16.msra.mxu1 %v1408_v55 }
 0x281   :  { %v673_v2 = vrot.slane %v666_v0, %v638_v49  ;;  %v677_v3 = vrot.slane %v666_v0, %v642_v50  ;;  %1299 = vmatprep.subr.bf16.mxu1 %v1554_v1 }
 0x283   :  { %v681_v4 = vadd.f32 %v677_v3, %v668_v57  ;;  %v680_v5 = vadd.f32 %v673_v2, %v667_v56  ;;  %v1409_v56 = vld [vmem:[#allocation8 + $0xd8] sm:$0xff]   ;;  %v1410_v57 = vld [vmem:[#allocation8 + $0xe0] sm:$0xff]  }
 0x284   :  { %1300 = vmatpush3.bf16.msra.mxu1 %v1409_v56 }
 0x285   :  { %vm683_vm6 = vcmp.gt.f32.partialorder %v681_v4, 0.0  ;;  %v685_v6 = vmul.f32 0.01, %v681_v4  ;;  %vm682_vm7 = vcmp.gt.f32.partialorder %v680_v5, 0.0  ;;  %v684_v7 = vmul.f32 0.01, %v680_v5  ;;  %1301 = vmatprep.subr.bf16.mxu1 %v1554_v1 }
 0x287   :  { %v687_v8 = vsel %vm683_vm6, %v681_v4, %v685_v6  ;;  %v686_v9 = vsel %vm682_vm7, %v680_v5, %v684_v7 }
 0x288   :  { %v689_v58 = vpack.c.bf16 %v687_v8, %v687_v8  ;;  %v688_v61 = vpack.c.bf16 %v686_v9, %v686_v9  ;;  %1302 = vmatpush3.bf16.msra.mxu1 %v1410_v57 }
 0x289   :  { %1303 = vmatprep.subr.bf16.mxu1 %v1554_v1 }
 0x28a   :  { %850 = vmatprep.mubr.bf16.mxu0 %v689_v58 }
 0x28b   :  { %851 = vmatmul.mubr.bf16.vlgmr.msra.gmra.mrb[4].mxu0 %v688_v61 }
 0x28c   :  { %1289 = vmatprep.mubr.msk.bf16.mxu0 %vm1553_vm0, %v1554_v1  ;;  %1274 = vmatpush3.bf16.msra.mxu0 %v1398_v10 }
 0x28d   :  { %1275 = vmatprep.subr.bf16.mxu0 %v1554_v1  ;;  %1304 = vmatpush3.bf16.msra.mxu1 %v1411_v59 }
 0x28e   :  { %1305 = vmatprep.subr.bf16.mxu1 %v1554_v1 }
 0x290   :  { %1276 = vmatpush3.bf16.msra.mxu0 %v1399_v11 }
 0x291   :  { %1277 = vmatprep.subr.bf16.mxu0 %v1554_v1  ;;  %1306 = vmatpush3.bf16.msra.mxu1 %v1412_v60 }
 0x292   :  { %1307 = vmatprep.subr.bf16.mxu1 %v1554_v1 }
 0x294   :  { %1278 = vmatpush3.bf16.msra.mxu0 %v1400_v12 }
 0x295   :  { %1279 = vmatprep.subr.bf16.mxu0 %v1554_v1  ;;  %1308 = vmatpush3.bf16.msra.mxu1 %v1413_v62 }
 0x298   :  { %1280 = vmatpush3.bf16.msra.mxu0 %v1401_v13 }
 0x299   :  { %1281 = vmatprep.subr.bf16.mxu0 %v1554_v1 }
 0x29c   :  { %1282 = vmatpush3.bf16.msra.mxu0 %v1402_v14 }
 0x29d   :  { %1283 = vmatprep.subr.bf16.mxu0 %v1554_v1 }
 0x2a0   :  { %1284 = vmatpush3.bf16.msra.mxu0 %v1403_v15 }
 0x2a1   :  { %1285 = vmatprep.subr.bf16.mxu0 %v1554_v1 }
 0x2a4   :  { %1286 = vmatpush3.bf16.msra.mxu0 %v1404_v16 }
 0x2a5   :  { %1287 = vmatprep.subr.bf16.mxu0 %v1554_v1 }
 0x2a8   :  { %1288 = vmatpush3.bf16.msra.mxu0 %v1405_v17 }
 0x35e   :  { %v1237_v18 = vpop.f32.mrb[4].mxu0 }
 0x35f   :  { %v1238_v19 = vpop.f32.mrb[5].mxu0 }
 0x360   :  { %v1239_v20 = vadd.f32 %v1238_v19, %v1237_v18  ;;  %v1240_v21 = vpop.f32.mrb[6].mxu0 }
 0x361   :  { %v1241_v22 = vpop.f32.mrb[7].mxu0 }
 0x362   :  { %v860_v23 = vrot.slane %v1239_v20, 4  ;;  %v866_v25 = vmul.f32 %v1239_v20, %v1239_v20 }
 0x364   :  { %v861_v27 = vadd.f32 %v1239_v20, %v860_v23  ;;  %v867_v28 = vrot.slane %v866_v25, 4  ;;  %v994_v23 = vld [vmem:[%s1747_s6 + $0xd] ss:$0 sm:$0xff] }
 0x366   :  { %v862_v29 = vrot.slane %v861_v27, 2  ;;  %v868_v24 = vadd.f32 %v867_v28, %v866_v25 }
 0x368   :  { %v863_v30 = vadd.f32 %v862_v29, %v861_v27  ;;  %v869_v31 = vrot.slane %v868_v24, 2 }
 0x36a   :  { %v864_v32 = vrot.slane %v863_v30, 1  ;;  %v870_v33 = vadd.f32 %v869_v31, %v868_v24 }
 0x36c   :  { %v865_v34 = vadd.f32 %v864_v32, %v863_v30  ;;  %v871_v35 = vrot.slane %v870_v33, 1  ;;  %v1040_v32 = vld [vmem:[%s1747_s6 + $0x6] ss:$0 sm:$0xff] }
 0x36e   :  { %v872_v36 = vadd.f32 %v871_v35, %v870_v33  ;;  %v873_v37 = vmul.f32 0.125, %v865_v34 }
 0x370   :  { %v874_v38 = vmul.f32 0.125, %v872_v36  ;;  %v875_v39 = vmul.f32 %v873_v37, %v873_v37 }
 0x372   :  { %v876_v40 = vsub.f32 %v874_v38, %v875_v39 }
 0x374   :  { %v877_v41 = vmax.f32 %v876_v40, 0.0 }
 0x376   :  { %v878_v42 = vadd.f32 1e-05, %v877_v41 }
 0x378   :  { %1422 = vrsqrt.f32 %v878_v42 }
 0x382   :  { %v1423_v43 = vpop.eup %1422 }
 0x383   :  { %v880_v44 = vmul.f32 %v1423_v43, %v858_v26 }
 0x385   :  { %v881_v46 = vmul.f32 %v880_v44, %v873_v37  ;;  %v883_v48 = vmul.f32 %v1239_v20, %v880_v44  ;;  %v993_v20 = vld [vmem:[%s1747_s6 + $0xc] ss:$0 sm:$0xff] }
 0x387   :  { %v882_v47 = vsub.f32 %v859_v45, %v881_v46 }
 0x389   :  { %v884_v49 = vadd.f32 %v883_v48, %v882_v47 }
 0x38b   :  { %vm885_vm8 = vcmp.gt.f32.partialorder %v884_v49, 0.0  ;;  %v886_v50 = vmul.f32 0.01, %v884_v49 }
 0x38d   :  { %v887_v51 = vsel %vm885_vm8, %v884_v49, %v886_v50 }
 0x38e   :  { %v888_v52 = vpack.c.bf16 %v887_v51, %v887_v51 }
 0x390   :  { %1290 = vmatmul.mubr.bf16.vlgmr.msra.gmra.mrb[8].mxu0 %v888_v52 }
 0x463   :  { %v987_v63 = vpop.f32.mrb[8].mxu0 }
 0x464   :  { %v995_v0 = vrot.slane %v987_v63, 4  ;;  %v1001_v2 = vmul.f32 %v987_v63, %v987_v63  ;;  %v1291_v3 = vpop.f32.mrb[9].mxu0 }
 0x465   :  { %v990_v4 = vpop.f32.mrb[10].mxu0 }
 0x466   :  { %v996_v5 = vadd.f32 %v995_v0, %v987_v63  ;;  %v1002_v6 = vrot.slane %v1001_v2, 4  ;;  %v1292_v7 = vpop.f32.mrb[11].mxu0 }
 0x468   :  { %v997_v8 = vrot.slane %v996_v5, 2  ;;  %v1003_v9 = vadd.f32 %v1002_v6, %v1001_v2 }
 0x46a   :  { %v998_v58 = vadd.f32 %v997_v8, %v996_v5  ;;  %v1004_v61 = vrot.slane %v1003_v9, 2 }
 0x46c   :  { %v999_v10 = vrot.slane %v998_v58, 1  ;;  %v1005_v11 = vadd.f32 %v1004_v61, %v1003_v9 }
 0x46e   :  { %v1000_v12 = vadd.f32 %v999_v10, %v998_v58  ;;  %v1006_v13 = vrot.slane %v1005_v11, 1 }
 0x470   :  { %v1007_v14 = vadd.f32 %v1006_v13, %v1005_v11  ;;  %v1008_v15 = vmul.f32 0.125, %v1000_v12 }
 0x472   :  { %v1009_v1 = vmul.f32 0.125, %v1007_v14  ;;  %v1010_v16 = vmul.f32 %v1008_v15, %v1008_v15 }
 0x474   :  { %v1011_v17 = vsub.f32 %v1009_v1, %v1010_v16 }
 0x476   :  { %v1012_v18 = vmax.f32 %v1011_v17, 0.0 }
 0x478   :  { %v1013_v19 = vadd.f32 1e-05, %v1012_v18 }
 0x47a   :  { %1424 = vrsqrt.f32 %v1013_v19 }
 0x484   :  { %v1425_v21 = vpop.eup %1424 }
 0x485   :  { %v1015_v22 = vmul.f32 %v1425_v21, %v993_v20 }
 0x487   :  { %v1016_v25 = vmul.f32 %v1015_v22, %v1008_v15  ;;  %v1018_v28 = vmul.f32 %v1015_v22, %v987_v63 }
 0x489   :  { %v1017_v27 = vsub.f32 %v994_v23, %v1016_v25 }
 0x48b   :  { %v1019_v29 = vadd.f32 %v1018_v28, %v1017_v27 }
 0x48d   :  { %vm1020_vm9 = vcmp.gt.f32.partialorder %v1019_v29, 0.0  ;;  %v1021_v24 = vmul.f32 0.01, %v1019_v29 }
 0x48f   :  { %v1022_v30 = vsel %vm1020_vm9, %v1019_v29, %v1021_v24 }
 0x490   :  { %v1023_v31 = vpack.c.bf16 %v1022_v30, %v1022_v30 }
 0x492   :  { %1310 = vmatmul.mubr.bf16.vlgmr.msra.gmra.mrb[4].mxu1 %v1023_v31 }
 0x565   :  { %v1123_v33 = vpop.f32.mrb[4].mxu1 }
 0x566   :  { %v1124_v34 = vadd.f32 %v1123_v33, %v1040_v32  ;;  %v1311_v35 = vpop.f32.mrb[5].mxu1 }
 0x567   :  { %v1126_v36 = vpop.f32.mrb[6].mxu1 }
 0x568   :  { %1129 = vst [vmem:[#allocation10] sm:$0xff] %v1124_v34  ;;  %v1312_v37 = vpop.f32.mrb[7].mxu1 }
 0x569   :  { %1525 = shalt.err (!%p1522_p8)
}
 0x56a   :  { %s1526_s6 = scalar_lea.hbm %s1748_s7, 128 }
 0x56b   :  { %p1527_p9 = scmp.ne.s32.totalorder %s1748_s7, %s1526_s6  ;;  %p1530_p10 = scmp.lt.u32.totalorder %s1526_s6, %s1748_s7 }
 0x56d   :  { %p1532_p11 = pnand %p1530_p10, %p1527_p9 }
 0x56f   :  { %1535 = shalt.err (!%p1532_p11)
}
 0x570   :  { %1139 = dma.vmem_to_hbm [thread:$0]  %s1137_s26, 128, %s1748_s7, [#allocation4]  }
 0x571   :  { %1542 = dma.done.wait [#allocation4], 128  }
 0x572   :  { %1543 = vsyncadd [#allocation4], 4294967168 }
 0x573   :  { %1143 = vsyncpa [#allocation3], 1 }
 0x574   :  { %1144 = vsyncpa [#allocation6], 1 }
 0x575   :  { %1145 = vsyncpa [#allocation9], 1 }
 0x576   :  { %1146 = vsyncpa [#allocation4], 1 }

</bundles_post_ra>
